<compile_context>
chip_gen: v7x
topology: tpu7x:2x2x1
jax: 0.10.0
libtpu: 0.0.40
codegen_flags: <defaults>
</compile_context>

<pallas_src>
import functools

import jax
import jax.numpy as jnp
from jax.experimental import pallas as pl
from jax.experimental.pallas import tpu as pltpu


def _attention_head_kernel(x_ref, wk_ref, wq_ref, wv_ref,
                           bk_ref, bq_ref, bv_ref, out_ref, *, encoder: bool):
    """x_ref: (b_blk, T, E); w*_ref: (E, H) pre-transposed (Wq pre-scaled);
    b*_ref: (1, H) f32 (bq pre-scaled); out_ref: (b_blk, T, H)."""
    b_blk, T, E = x_ref.shape
    H = wk_ref.shape[1]

    # One big (b_blk*T, E) @ (E, H) matmul per projection; f32 accumulation
    # via preferred_element_type, inputs stay in their native dtype (bf16 MXU
    # path when activations are bf16).
    x2 = x_ref[...].reshape(b_blk * T, E)
    xk = jnp.dot(x2, wk_ref[...], preferred_element_type=jnp.float32) + bk_ref[...]
    xq = jnp.dot(x2, wq_ref[...], preferred_element_type=jnp.float32) + bq_ref[...]
    xv = jnp.dot(x2, wv_ref[...], preferred_element_type=jnp.float32) + bv_ref[...]
    xk = xk.reshape(b_blk, T, H)
    xq = xq.reshape(b_blk, T, H)
    xv = xv.reshape(b_blk, T, H)

    # Attention scores (b_blk, T, T): contract over H directly — no explicit
    # transpose of xk (keeps the transpose implicit in the MXU feed).
    wei = jax.lax.dot_general(
        xq, xk, (((2,), (2,)), ((0,), (0,))),
        preferred_element_type=jnp.float32)

    if encoder:
        row = jax.lax.broadcasted_iota(jnp.int32, (T, T), 0)
        col = jax.lax.broadcasted_iota(jnp.int32, (T, T), 1)
        wei = jnp.where(col <= row, wei, -jnp.inf)   # broadcasts over batch

    # sqrt(head_size) scale is already folded into Wq / bq in the wrapper.
    # Numerically-stable softmax over the key (lane) axis.  Diagonal is never
    # masked, so the row max is finite and exp(-inf - m) == 0 (no NaN risk).
    m = jnp.max(wei, axis=-1, keepdims=True)
    e = jnp.exp(wei - m)
    s = jnp.sum(e, axis=-1, keepdims=True)
    # approx=True would use the EUP vrcp slot for free but adds ~1e-3-level
    # relative error; kept exact to preserve the 1e-4 correctness tolerance.
    p = e * pl.reciprocal(s, approx=False)

    # P @ V in bf16 when activations are bf16 (native MXU path), f32 otherwise.
    mm_dtype = jnp.bfloat16 if x_ref.dtype == jnp.bfloat16 else jnp.float32
    out = jax.lax.dot_general(
        p.astype(mm_dtype), xv.astype(mm_dtype),
        (((2,), (1,)), ((0,), (0,))),
        preferred_element_type=jnp.float32)          # (b_blk, T, H)
    out_ref[...] = out.astype(out_ref.dtype)


def _pick_batch_block(B, T, E, H, itemsize):
    """Batch elements per grid step: big enough to amortize the ~0.35 µs
    per-step overhead, >= 2 steps when possible (both v7x TensorCores), and
    bounded so per-step VMEM stays far below the v7x scoped default."""
    budget = 8 * 1024 * 1024  # conservative per-step VMEM budget (bytes)
    per_b = (T * E * itemsize * 2        # x tile, double-buffered
             + T * T * 4 * 3             # scores / exp / probs (f32)
             + T * H * 4 * 4)            # xk/xq/xv/out (f32)
    cap = max(1, budget // max(per_b, 1))
    blk = min(B // 2, cap) if B >= 4 else min(B, cap)
    blk = max(blk, 1)
    while B % blk:                        # must divide B (no padded blocks)
        blk -= 1
    return blk


def attention_head(x, wk, bk, wq, bq, wv, bv, *, encoder: bool = True,
                   b_blk: int | None = None):
    """Pallas TPU forward of AttentionHead.

    x:  (B, T, E)   activations (f32 or bf16)
    w*: (H, E)      nn.Linear weights (PyTorch layout)
    b*: (H,)        nn.Linear biases
    Returns (B, T, H) in x.dtype.
    """
    B, T, E = x.shape
    H = wk.shape[0]
    if b_blk is None:
        b_blk = _pick_batch_block(B, T, E, H, jnp.dtype(x.dtype).itemsize)
    assert B % b_blk == 0
    grid = (B // b_blk,)

    # Wrapper-side layout plumbing (zero kernel cost):
    #  * pre-transpose weights to (E, H) for plain (.,E)@(E,H) MXU matmuls,
    #  * fold the sqrt(head_size) softmax scale into Wq / bq,
    #  * cast weights to x.dtype (bf16 MXU feed when x is bf16); biases stay
    #    f32 — they are added to the f32 accumulators.
    scale = float(H) ** 0.5
    wk_t = jnp.asarray(wk, jnp.float32).T.astype(x.dtype)
    wq_t = (jnp.asarray(wq, jnp.float32) * scale).T.astype(x.dtype)
    wv_t = jnp.asarray(wv, jnp.float32).T.astype(x.dtype)
    bk2 = jnp.asarray(bk, jnp.float32).reshape(1, H)
    bq2 = (jnp.asarray(bq, jnp.float32) * scale).reshape(1, H)
    bv2 = jnp.asarray(bv, jnp.float32).reshape(1, H)

    kernel = functools.partial(_attention_head_kernel, encoder=encoder)

    return pl.pallas_call(
        kernel,
        out_shape=jax.ShapeDtypeStruct((B, T, H), x.dtype),
        grid_spec=pltpu.PrefetchScalarGridSpec(
            num_scalar_prefetch=0,
            grid=grid,
            in_specs=[
                pl.BlockSpec((b_blk, T, E), lambda b: (b, 0, 0)),  # x tile
                pl.BlockSpec((E, H), lambda b: (0, 0)),            # Wk^T
                pl.BlockSpec((E, H), lambda b: (0, 0)),            # Wq^T * sqrt(H)
                pl.BlockSpec((E, H), lambda b: (0, 0)),            # Wv^T
                pl.BlockSpec((1, H), lambda b: (0, 0)),            # bk
                pl.BlockSpec((1, H), lambda b: (0, 0)),            # bq * sqrt(H)
                pl.BlockSpec((1, H), lambda b: (0, 0)),            # bv
            ],
            out_specs=pl.BlockSpec((b_blk, T, H), lambda b: (b, 0, 0)),
        ),
        compiler_params=pltpu.CompilerParams(
            dimension_semantics=("parallel",),
        ),
    )(x, wk_t, wq_t, wv_t, bk2, bq2, bv2)


def _reference(x, wk, bk, wq, bq, wv, bv, *, encoder: bool):
    """Plain-JAX mirror of the PyTorch module (same quirky scaling)."""
    xf = x.astype(jnp.float32)
    xk = xf @ wk.T + bk
    xq = xf @ wq.T + bq
    xv = xf @ wv.T + bv
    wei = xq @ jnp.swapaxes(xk, -1, -2)
    if encoder:
        T = x.shape[1]
        tril = jnp.tril(jnp.ones((T, T), jnp.float32))
        wei = jnp.where(tril == 0, -jnp.inf, wei)
    head_size = wk.shape[0]
    wei = jax.nn.softmax(wei / float(head_size) ** (-0.5), axis=-1)
    return (wei @ xv).astype(x.dtype)


if __name__ == "__main__":
    # Small shapes consistent with the module: batch=2, block_size=32,
    # emb_size=32, head_size=16, encoder=True (causal mask active).
    B, T, E, H = 2, 32, 32, 16
    ENCODER = True

    key = jax.random.PRNGKey(0)
    kx, kk, kbk, kq, kbq, kv, kbv = jax.random.split(key, 7)
    x = jax.random.normal(kx, (B, T, E), dtype=jnp.float32)
    wk = jax.random.normal(kk, (H, E), dtype=jnp.float32) * 0.1
    bk = jax.random.normal(kbk, (H,), dtype=jnp.float32) * 0.1
    wq = jax.random.normal(kq, (H, E), dtype=jnp.float32) * 0.1
    bq = jax.random.normal(kbq, (H,), dtype=jnp.float32) * 0.1
    wv = jax.random.normal(kv, (H, E), dtype=jnp.float32) * 0.1
    bv = jax.random.normal(kbv, (H,), dtype=jnp.float32) * 0.1

    out = attention_head(x, wk, bk, wq, bq, wv, bv, encoder=ENCODER)
    out = jax.block_until_ready(out)

    ref = _reference(x, wk, bk, wq, bq, wv, bv, encoder=ENCODER)

    assert out.shape == (B, T, H)
    assert jnp.allclose(out, ref, atol=1e-4, rtol=1e-4), (
        float(jnp.max(jnp.abs(out - ref))))

    print("KERNEL_OK")
</pallas_src>

<mosaic_0001>
module attributes {stable_mosaic.version = 11 : i64} {
  func.func @_attention_head_kernel(%arg0: i32, %arg1: memref<2x32x32xf32, #tpu.memory_space<vmem>>, %arg2: memref<32x16xf32, #tpu.memory_space<vmem>>, %arg3: memref<32x16xf32, #tpu.memory_space<vmem>>, %arg4: memref<32x16xf32, #tpu.memory_space<vmem>>, %arg5: memref<1x16xf32, #tpu.memory_space<vmem>>, %arg6: memref<1x16xf32, #tpu.memory_space<vmem>>, %arg7: memref<1x16xf32, #tpu.memory_space<vmem>>, %arg8: memref<2x32x16xf32, #tpu.memory_space<vmem>>) attributes {dimension_semantics = [#tpu.dimension_semantics<parallel>], iteration_bounds = array<i64: 1>, scalar_prefetch = 0 : i64, scratch_operands = 0 : i64, tpu.core_type = #tpu.core_type<tc>, window_params = [{transform_indices = @transform_0, window_bounds = array<i64: 2, 32, 32>}, {pipeline_mode = #tpu.pipeline_mode<synchronous>, transform_indices = @transform_1, window_bounds = array<i64: 32, 16>}, {pipeline_mode = #tpu.pipeline_mode<synchronous>, transform_indices = @transform_2, window_bounds = array<i64: 32, 16>}, {pipeline_mode = #tpu.pipeline_mode<synchronous>, transform_indices = @transform_3, window_bounds = array<i64: 32, 16>}, {pipeline_mode = #tpu.pipeline_mode<synchronous>, transform_indices = @transform_4, window_bounds = array<i64: 1, 16>}, {pipeline_mode = #tpu.pipeline_mode<synchronous>, transform_indices = @transform_5, window_bounds = array<i64: 1, 16>}, {pipeline_mode = #tpu.pipeline_mode<synchronous>, transform_indices = @transform_6, window_bounds = array<i64: 1, 16>}, {transform_indices = @transform_7, window_bounds = array<i64: 2, 32, 16>}]} {
    %c0 = arith.constant 0 : index
    %c0_0 = arith.constant 0 : index
    %c0_1 = arith.constant 0 : index
    %0 = vector.load %arg1[%c0, %c0_0, %c0_1] : memref<2x32x32xf32, #tpu.memory_space<vmem>>, vector<2x32x32xf32>
    %1 = vector.shape_cast %0 : vector<2x32x32xf32> to vector<64x32xf32>
    %c0_2 = arith.constant 0 : index
    %c0_3 = arith.constant 0 : index
    %2 = vector.load %arg2[%c0_2, %c0_3] : memref<32x16xf32, #tpu.memory_space<vmem>>, vector<32x16xf32>
    %cst = arith.constant dense<0.000000e+00> : vector<64x16xf32>
    %3 = tpu.matmul %1, %2, %cst {dimension_numbers = #tpu.dot_dimension_numbers<[1], [0], [0], [1], [0, 0, 1, 1], [], []>} : vector<64x32xf32>, vector<32x16xf32>, vector<64x16xf32> -> vector<64x16xf32>
    %c0_4 = arith.constant 0 : index
    %c0_5 = arith.constant 0 : index
    %4 = vector.load %arg5[%c0_4, %c0_5] : memref<1x16xf32, #tpu.memory_space<vmem>>, vector<1x16xf32>
    %5 = vector.broadcast %4 : vector<1x16xf32> to vector<64x16xf32>
    %6 = arith.addf %3, %5 : vector<64x16xf32>
    %c0_6 = arith.constant 0 : index
    %c0_7 = arith.constant 0 : index
    %7 = vector.load %arg3[%c0_6, %c0_7] : memref<32x16xf32, #tpu.memory_space<vmem>>, vector<32x16xf32>
    %cst_8 = arith.constant dense<0.000000e+00> : vector<64x16xf32>
    %8 = tpu.matmul %1, %7, %cst_8 {dimension_numbers = #tpu.dot_dimension_numbers<[1], [0], [0], [1], [0, 0, 1, 1], [], []>} : vector<64x32xf32>, vector<32x16xf32>, vector<64x16xf32> -> vector<64x16xf32>
    %c0_9 = arith.constant 0 : index
    %c0_10 = arith.constant 0 : index
    %9 = vector.load %arg6[%c0_9, %c0_10] : memref<1x16xf32, #tpu.memory_space<vmem>>, vector<1x16xf32>
    %10 = vector.broadcast %9 : vector<1x16xf32> to vector<64x16xf32>
    %11 = arith.addf %8, %10 : vector<64x16xf32>
    %c0_11 = arith.constant 0 : index
    %c0_12 = arith.constant 0 : index
    %12 = vector.load %arg4[%c0_11, %c0_12] : memref<32x16xf32, #tpu.memory_space<vmem>>, vector<32x16xf32>
    %cst_13 = arith.constant dense<0.000000e+00> : vector<64x16xf32>
    %13 = tpu.matmul %1, %12, %cst_13 {dimension_numbers = #tpu.dot_dimension_numbers<[1], [0], [0], [1], [0, 0, 1, 1], [], []>} : vector<64x32xf32>, vector<32x16xf32>, vector<64x16xf32> -> vector<64x16xf32>
    %c0_14 = arith.constant 0 : index
    %c0_15 = arith.constant 0 : index
    %14 = vector.load %arg7[%c0_14, %c0_15] : memref<1x16xf32, #tpu.memory_space<vmem>>, vector<1x16xf32>
    %15 = vector.broadcast %14 : vector<1x16xf32> to vector<64x16xf32>
    %16 = arith.addf %13, %15 : vector<64x16xf32>
    %17 = vector.shape_cast %6 : vector<64x16xf32> to vector<2x32x16xf32>
    %18 = vector.shape_cast %11 : vector<64x16xf32> to vector<2x32x16xf32>
    %19 = vector.shape_cast %16 : vector<64x16xf32> to vector<2x32x16xf32>
    %cst_16 = arith.constant dense<0.000000e+00> : vector<2x32x32xf32>
    %20 = tpu.matmul %18, %17, %cst_16 {dimension_numbers = #tpu.dot_dimension_numbers<[2], [2], [1], [1], [0, 0, 0, 1, 1, 1], [0], [0]>} : vector<2x32x16xf32>, vector<2x32x16xf32>, vector<2x32x32xf32> -> vector<2x32x32xf32>
    %21 = tpu.iota {dimensions = array<i32: 0>} : vector<32x32xi32>
    %22 = tpu.iota {dimensions = array<i32: 1>} : vector<32x32xi32>
    %23 = arith.cmpi sle, %22, %21 : vector<32x32xi32>
    %cst_17 = arith.constant 0xFF800000 : f32
    %24 = vector.shape_cast %23 : vector<32x32xi1> to vector<1x32x32xi1>
    %25 = vector.broadcast %24 : vector<1x32x32xi1> to vector<2x32x32xi1>
    %26 = vector.broadcast %cst_17 : f32 to vector<2x32x32xf32>
    %27 = arith.select %25, %20, %26 : vector<2x32x32xi1>, vector<2x32x32xf32>
    %cst_18 = arith.constant dense<0xFF800000> : vector<2x32xf32>
    %28 = vector.multi_reduction <maximumf>, %27, %cst_18 [2] : vector<2x32x32xf32> to vector<2x32xf32>
    %29 = vector.shape_cast %28 : vector<2x32xf32> to vector<2x32x1xf32>
    %30 = vector.broadcast %29 : vector<2x32x1xf32> to vector<2x32x32xf32>
    %31 = arith.subf %27, %30 : vector<2x32x32xf32>
    %32 = math.exp %31 : vector<2x32x32xf32>
    %cst_19 = arith.constant dense<0.000000e+00> : vector<2x32xf32>
    %33 = vector.multi_reduction <add>, %32, %cst_19 [2] : vector<2x32x32xf32> to vector<2x32xf32>
    %34 = vector.shape_cast %33 : vector<2x32xf32> to vector<2x32x1xf32>
    %35 = tpu.reciprocal %34 : vector<2x32x1xf32> -> vector<2x32x1xf32>
    %36 = vector.broadcast %35 : vector<2x32x1xf32> to vector<2x32x32xf32>
    %37 = arith.mulf %32, %36 : vector<2x32x32xf32>
    %cst_20 = arith.constant dense<0.000000e+00> : vector<2x32x16xf32>
    %38 = tpu.matmul %37, %19, %cst_20 {dimension_numbers = #tpu.dot_dimension_numbers<[2], [1], [1], [2], [0, 0, 0, 1, 1, 2], [0], [0]>} : vector<2x32x32xf32>, vector<2x32x16xf32>, vector<2x32x16xf32> -> vector<2x32x16xf32>
    %c0_21 = arith.constant 0 : index
    %c0_22 = arith.constant 0 : index
    %c0_23 = arith.constant 0 : index
    %39 = vector.load %arg8[%c0_21, %c0_22, %c0_23] : memref<2x32x16xf32, #tpu.memory_space<vmem>>, vector<2x32x16xf32>
    tpu.vector_store %arg8[%c0_21, %c0_22, %c0_23], %38 {strides = array<i32>} : memref<2x32x16xf32, #tpu.memory_space<vmem>>, vector<2x32x16xf32>,
    return
  }
  func.func @transform_0(%arg0: i32) -> (i32, i32, i32) {
    %c0_i32 = arith.constant 0 : i32
    %c0_i32_0 = arith.constant 0 : i32
    %c0_i32_1 = arith.constant 0 : i32
    return %arg0, %c0_i32, %c0_i32_0 : i32, i32, i32
  }
  func.func @transform_1(%arg0: i32) -> (i32, i32) {
    %c0_i32 = arith.constant 0 : i32
    %c0_i32_0 = arith.constant 0 : i32
    %c0_i32_1 = arith.constant 0 : i32
    return %c0_i32, %c0_i32_0 : i32, i32
  }
  func.func @transform_2(%arg0: i32) -> (i32, i32) {
    %c0_i32 = arith.constant 0 : i32
    %c0_i32_0 = arith.constant 0 : i32
    %c0_i32_1 = arith.constant 0 : i32
    return %c0_i32, %c0_i32_0 : i32, i32
  }
  func.func @transform_3(%arg0: i32) -> (i32, i32) {
    %c0_i32 = arith.constant 0 : i32
    %c0_i32_0 = arith.constant 0 : i32
    %c0_i32_1 = arith.constant 0 : i32
    return %c0_i32, %c0_i32_0 : i32, i32
  }
  func.func @transform_4(%arg0: i32) -> (i32, i32) {
    %c0_i32 = arith.constant 0 : i32
    %c0_i32_0 = arith.constant 0 : i32
    %c0_i32_1 = arith.constant 0 : i32
    return %c0_i32, %c0_i32_0 : i32, i32
  }
  func.func @transform_5(%arg0: i32) -> (i32, i32) {
    %c0_i32 = arith.constant 0 : i32
    %c0_i32_0 = arith.constant 0 : i32
    %c0_i32_1 = arith.constant 0 : i32
    return %c0_i32, %c0_i32_0 : i32, i32
  }
  func.func @transform_6(%arg0: i32) -> (i32, i32) {
    %c0_i32 = arith.constant 0 : i32
    %c0_i32_0 = arith.constant 0 : i32
    %c0_i32_1 = arith.constant 0 : i32
    return %c0_i32, %c0_i32_0 : i32, i32
  }
  func.func @transform_7(%arg0: i32) -> (i32, i32, i32) {
    %c0_i32 = arith.constant 0 : i32
    %c0_i32_0 = arith.constant 0 : i32
    %c0_i32_1 = arith.constant 0 : i32
    return %arg0, %c0_i32, %c0_i32_0 : i32, i32, i32
  }
}

</mosaic_0001>

<bundles_post_ra>
// kernel: tpu_custom_call.1
= control target key start
LH: loop header
LB: loop body
LE: loop exit
PB: predicated region body
PF: predicated region fallthrough
CT: control target
= control target key end

     0   :  { %vm45_vm0 = vcmask 261120   ;;  %vm407_vm1 = vcmask 130048   ;;  %s1513_s1 = inlined_call_operand.vmem [shape: f32[32,16], index: 1, kind: input, shape index: {}]   ;;  %s1514_s0 = inlined_call_operand.vmem [shape: f32[2,32,32], index: 0, kind: input, shape index: {}]   ;;  %s1515_s2 = inlined_call_operand.vmem [shape: f32[32,16], index: 2, kind: input, shape index: {}]   ;;  %s1516_s3 = inlined_call_operand.vmem [shape: f32[32,16], index: 3, kind: input, shape index: {}]   ;;  %s1517_s4 = inlined_call_operand.vmem [shape: f32[1,16], index: 4, kind: input, shape index: {}]   ;;  %s1518_s5 = inlined_call_operand.vmem [shape: f32[1,16], index: 5, kind: input, shape index: {}]   ;;  %s1519_s6 = inlined_call_operand.vmem [shape: f32[1,16], index: 6, kind: input, shape index: {}]   ;;  %s1520_s7 = inlined_call_operand.vmem [shape: f32[2,32,16], index: 7, kind: output, shape index: {}]  }
   0x1   :  { %v34_v0 = vld [vmem:[%s1513_s1] sm:$0xff]  ;;  %v35_v1 = vld [vmem:[%s1513_s1 + $0x8] sm:$0xff]  ;;  %v36_v2 = vld [vmem:[%s1513_s1 + $0x10] sm:$0xff] }
   0x2   :  { %v1182_v3 = vpack.c.bf16 %v35_v1, %v34_v0  ;;  %v37_v4 = vld [vmem:[%s1513_s1 + $0x18] sm:$0xff]  ;;  %v26_v5 = vld [vmem:[%s1514_s0] sm:$0xff]  ;;  %v176_v8 = vld [vmem:[%s1515_s2 + $0x8] sm:$0xff] }
   0x3   :  { %v1186_v6 = vpack.c.bf16 %v37_v4, %v36_v2  ;;  %1074 = vmatprep.mubr.msk.f32.mxu0 %vm45_vm0, %v26_v5  ;;  %1094 = vmatprep.mubr.msk.f32.mxu1 %vm45_vm0, %v26_v5  ;;  %v175_v7 = vld [vmem:[%s1515_s2] sm:$0xff]  ;;  %v177_v10 = vld [vmem:[%s1515_s2 + $0x10] sm:$0xff]  ;;  %v178_v11 = vld [vmem:[%s1515_s2 + $0x18] sm:$0xff] }
   0x4   :  { %1183 = vmatprep.subr.bf16.mxu0 %v1182_v3  ;;  %v1190_v9 = vpack.c.bf16 %v176_v8, %v175_v7  ;;  %v1194_v12 = vpack.c.bf16 %v178_v11, %v177_v10  ;;  %v27_v13 = vld [vmem:[%s1514_s0 + $0x8] sm:$0xff]  ;;  %v28_v14 = vld [vmem:[%s1514_s0 + $0x10] sm:$0xff]  ;;  %v29_v15 = vld [vmem:[%s1514_s0 + $0x18] sm:$0xff] }
   0x5   :  { %1185 = vmatpush3.bf16.msra.mxu0 %v1182_v3  ;;  %v30_v16 = vld [vmem:[%s1514_s0 + $0x20] sm:$0xff]  ;;  %v31_v17 = vld [vmem:[%s1514_s0 + $0x28] sm:$0xff]  ;;  %v32_v18 = vld [vmem:[%s1514_s0 + $0x30] sm:$0xff] }
   0x6   :  { %1187 = vmatprep.subr.bf16.mxu0 %v1186_v6  ;;  %1191 = vmatprep.subr.bf16.mxu1 %v1190_v9  ;;  %v33_v19 = vld [vmem:[%s1514_s0 + $0x38] sm:$0xff]  ;;  %v291_v20 = vld [vmem:[%s1516_s3] sm:$0xff]  ;;  %v292_v21 = vld [vmem:[%s1516_s3 + $0x8] sm:$0xff] }
   0x7   :  { %1193 = vmatpush3.bf16.msra.mxu1 %v1190_v9  ;;  %v1198_v22 = vpack.c.bf16 %v292_v21, %v291_v20  ;;  %v293_v23 = vld [vmem:[%s1516_s3 + $0x10] sm:$0xff]  ;;  %v294_v24 = vld [vmem:[%s1516_s3 + $0x18] sm:$0xff]  ;;  %v947_v26 = vld [vmem:[%s1517_s4] ss:$0 sm:$0xff] }
   0x8   :  { %1195 = vmatprep.subr.bf16.mxu1 %v1194_v12  ;;  %v1202_v25 = vpack.c.bf16 %v294_v24, %v293_v23  ;;  %v956_v31 = vld [vmem:[%s1518_s5] ss:$0 sm:$0xff]  ;;  %vm1410_vm2 = vmpackc.low %vm407_vm1, %vm407_vm1 }
   0x9   :  { %1189 = vmatpush3.bf16.msra.mxu0 %v1186_v6  ;;  %v965_v1 = vld [vmem:[%s1519_s6] ss:$0 sm:$0xff] }
   0xa   :  { %1199 = vmatprep.subr.bf16.mxu0 %v1198_v22 }
   0xb   :  { %1197 = vmatpush3.bf16.msra.mxu1 %v1194_v12 }
   0xc   :  { %1075 = vmatmul.mubr.msk.f32.vlgmr.msra.gmra.mrb[0].mxu0 %vm45_vm0, %v27_v13 }
   0xd   :  { %1077 = vmatprep.mubr.msk.f32.mxu0 %vm45_vm0, %v28_v14  ;;  %1201 = vmatpush3.bf16.msra.mxu0 %v1198_v22  ;;  %v626_v22 = vlaneseq }
   0xe   :  { %1095 = vmatmul.mubr.msk.f32.vlgmr.msra.gmra.mrb[0].mxu1 %vm45_vm0, %v27_v13  ;;  %1203 = vmatprep.subr.bf16.mxu0 %v1202_v25 }
   0xf   :  { %1097 = vmatprep.mubr.msk.f32.mxu1 %vm45_vm0, %v28_v14  ;;  %v627_v23 = vshrl.u32 %v626_v22, 7  ;;  %v632_v24 = vand.u32 127, %v626_v22 }
  0x10   :  { %1078 = vmatmul.mubr.msk.f32.gmra.mrb[2].mxu0 %vm45_vm0, %v29_v15 }
  0x11   :  { %1080 = vmatprep.mubr.msk.f32.mxu0 %vm45_vm0, %v30_v16  ;;  %1205 = vmatpush3.bf16.msra.mxu0 %v1202_v25  ;;  %v628_v25 = vadd.s32 8, %v627_v23  ;;  %vm633_vm3 = vcmp.le.s32.totalorder %v632_v24, %v627_v23 }
  0x12   :  { %1098 = vmatmul.mubr.msk.f32.gmra.mrb[2].mxu1 %vm45_vm0, %v29_v15 }
  0x13   :  { %1100 = vmatprep.mubr.msk.f32.mxu1 %vm45_vm0, %v30_v16  ;;  %vm634_vm4 = vcmp.le.s32.totalorder %v632_v24, %v628_v25 }
  0x14   :  { %1081 = vmatmul.mubr.msk.f32.gmra.mrb[4].mxu0 %vm45_vm0, %v31_v17 }
  0x15   :  { %1083 = vmatprep.mubr.msk.f32.mxu0 %vm45_vm0, %v32_v18 }
  0x16   :  { %1101 = vmatmul.mubr.msk.f32.gmra.mrb[4].mxu1 %vm45_vm0, %v31_v17 }
  0x17   :  { %1103 = vmatprep.mubr.msk.f32.mxu1 %vm45_vm0, %v32_v18 }
  0x18   :  { %1084 = vmatmul.mubr.msk.f32.gmra.mrb[6].mxu0 %vm45_vm0, %v33_v19 }
  0x19   :  { %1114 = vmatprep.mubr.msk.f32.mxu0 %vm45_vm0, %v26_v5 }
  0x1a   :  { %1104 = vmatmul.mubr.msk.f32.gmra.mrb[6].mxu1 %vm45_vm0, %v33_v19 }
  0x1c   :  { %1115 = vmatmul.mubr.msk.f32.vlgmr.msra.gmra.mrb[8].mxu0 %vm45_vm0, %v27_v13 }
  0x1d   :  { %1117 = vmatprep.mubr.msk.f32.mxu0 %vm45_vm0, %v28_v14 }
  0x20   :  { %1118 = vmatmul.mubr.msk.f32.gmra.mrb[10].mxu0 %vm45_vm0, %v29_v15 }
  0x21   :  { %1120 = vmatprep.mubr.msk.f32.mxu0 %vm45_vm0, %v30_v16 }
  0x24   :  { %1121 = vmatmul.mubr.msk.f32.gmra.mrb[12].mxu0 %vm45_vm0, %v31_v17 }
  0x25   :  { %1123 = vmatprep.mubr.msk.f32.mxu0 %vm45_vm0, %v32_v18 }
  0x28   :  { %1124 = vmatmul.mubr.msk.f32.gmra.mrb[14].mxu0 %vm45_vm0, %v33_v19 }
  0xdf   :  { %v1076_v27 = vpop.f32.mrb[0].mxu0 }
  0xe0   :  { %v142_v28 = vadd.f32 %v1076_v27, %v947_v26  ;;  %v136_v29 = vpop.f32.mrb[1].mxu0 }
  0xe1   :  { %v137_v30 = vadd.f32 %v947_v26, %v136_v29  ;;  %v1096_v33 = vpop.f32.mrb[0].mxu1  ;;  %v630_v29 = vadd.s32 24, %v627_v23 }
  0xe2   :  { %v252_v36 = vpop.f32.mrb[1].mxu1  ;;  %v258_v60 = vadd.f32 %v1096_v33, %v956_v31 }
  0xe3   :  { %v1206_v34 = vpack.c.bf16 %v142_v28, %v137_v30  ;;  %v1079_v35 = vpop.f32.mrb[2].mxu0  ;;  %v253_v39 = vadd.f32 %v956_v31, %v252_v36  ;;  %vm636_vm6 = vcmp.le.s32.totalorder %v632_v24, %v630_v29 }
  0xe4   :  { %v152_v37 = vadd.f32 %v1079_v35, %v947_v26  ;;  %v146_v38 = vpop.f32.mrb[3].mxu0 }
  0xe5   :  { %1208 = vmatprep.subr.msk.bf16.mxu1 %vm1410_vm2, %v1206_v34  ;;  %v147_v40 = vadd.f32 %v947_v26, %v146_v38  ;;  %v1099_v41 = vpop.f32.mrb[2].mxu1  ;;  %1134 = vmatprep.mubr.msk.f32.mxu1 %vm407_vm1, %v253_v39 }
  0xe6   :  { %1211 = vmatpush3.bf16.xpose.msk.msra.mxu1 %vm1410_vm2, %v1206_v34  ;;  %v262_v44 = vpop.f32.mrb[3].mxu1  ;;  %v268_v61 = vadd.f32 %v1099_v41, %v956_v31 }
  0xe7   :  { %v1212_v42 = vpack.c.bf16 %v152_v37, %v147_v40  ;;  %v1082_v43 = vpop.f32.mrb[4].mxu0  ;;  %v263_v59 = vadd.f32 %v956_v31, %v262_v44 }
  0xe8   :  { %v162_v45 = vadd.f32 %v1082_v43, %v947_v26  ;;  %v156_v46 = vpop.f32.mrb[5].mxu0 }
  0xe9   :  { %v157_v47 = vadd.f32 %v947_v26, %v156_v46  ;;  %1214 = vmatprep.subr.msk.bf16.mxu1 %vm1410_vm2, %v1212_v42  ;;  %v1102_v48 = vpop.f32.mrb[4].mxu1 }
  0xea   :  { %v272_v51 = vpop.f32.mrb[5].mxu1  ;;  %v278_v62 = vadd.f32 %v1102_v48, %v956_v31 }
  0xeb   :  { %v1218_v49 = vpack.c.bf16 %v162_v45, %v157_v47  ;;  %v1085_v50 = vpop.f32.mrb[6].mxu0  ;;  %v273_v54 = vadd.f32 %v956_v31, %v272_v51 }
  0xec   :  { %v172_v52 = vadd.f32 %v1085_v50, %v947_v26  ;;  %v166_v53 = vpop.f32.mrb[7].mxu0 }
  0xed   :  { %1220 = vmatprep.subr.msk.bf16.mxu0 %vm1410_vm2, %v1218_v49  ;;  %v167_v55 = vadd.f32 %v947_v26, %v166_v53  ;;  %v1105_v56 = vpop.f32.mrb[6].mxu1  ;;  %1148 = vmatprep.mubr.msk.f32.mxu0 %vm407_vm1, %v273_v54  ;;  %v629_v26 = vadd.s32 16, %v627_v23 }
  0xee   :  { %1217 = vmatpush3.bf16.xpose.msk.msra.mxu1 %vm1410_vm2, %v1212_v42  ;;  %1223 = vmatpush3.bf16.xpose.msk.msra.mxu0 %vm1410_vm2, %v1218_v49  ;;  %v282_v58 = vpop.f32.mrb[7].mxu1  ;;  %v288_v0 = vadd.f32 %v1105_v56, %v956_v31 }
  0xef   :  { %v1224_v57 = vpack.c.bf16 %v172_v52, %v167_v55  ;;  %v283_v63 = vadd.f32 %v956_v31, %v282_v58  ;;  %v1116_v2 = vpop.f32.mrb[8].mxu0  ;;  %vm635_vm5 = vcmp.le.s32.totalorder %v632_v24, %v629_v26 }
  0xf0   :  { %v374_v3 = vadd.f32 %v1116_v2, %v965_v1  ;;  %v368_v4 = vpop.f32.mrb[9].mxu0 }
  0xf1   :  { %1226 = vmatprep.subr.msk.bf16.mxu0 %vm1410_vm2, %v1224_v57  ;;  %v369_v5 = vadd.f32 %v965_v1, %v368_v4 }
  0xf3   :  { %v1230_v6 = vpack.c.bf16 %v374_v3, %v369_v5  ;;  %v1119_v7 = vpop.f32.mrb[10].mxu0 }
  0xf4   :  { %v384_v8 = vadd.f32 %v1119_v7, %v965_v1  ;;  %v378_v9 = vpop.f32.mrb[11].mxu0 }
  0xf5   :  { %1135 = vmatmul.mubr.msk.f32.vlgmr.msra.gmra.mrb[8].mxu1 %vm407_vm1, %v258_v60  ;;  %v379_v10 = vadd.f32 %v965_v1, %v378_v9  ;;  %1231 = vmatprep.subr.bf16.mxu1 %v1230_v6 }
  0xf6   :  { %1229 = vmatpush3.bf16.xpose.msk.msra.mxu0 %vm1410_vm2, %v1224_v57  ;;  %1137 = vmatprep.mubr.msk.f32.mxu1 %vm407_vm1, %v263_v59 }
  0xf7   :  { %1233 = vmatpush3.bf16.msra.mxu1 %v1230_v6  ;;  %v1234_v11 = vpack.c.bf16 %v384_v8, %v379_v10  ;;  %v1122_v12 = vpop.f32.mrb[12].mxu0 }
  0xf8   :  { %v394_v13 = vadd.f32 %v1122_v12, %v965_v1  ;;  %v388_v14 = vpop.f32.mrb[13].mxu0 }
  0xf9   :  { %1138 = vmatmul.mubr.msk.f32.gmra.mrb[10].mxu1 %vm407_vm1, %v268_v61  ;;  %1235 = vmatprep.subr.bf16.mxu1 %v1234_v11  ;;  %v389_v15 = vadd.f32 %v965_v1, %v388_v14 }
  0xfb   :  { %1237 = vmatpush3.bf16.msra.mxu1 %v1234_v11  ;;  %v1441_v16 = vpack.c.bf16 %v394_v13, %v389_v15  ;;  %v1125_v17 = vpop.f32.mrb[14].mxu0 }
  0xfc   :  { %v404_v18 = vadd.f32 %v1125_v17, %v965_v1  ;;  %v398_v19 = vpop.f32.mrb[15].mxu0 }
  0xfd   :  { %1149 = vmatmul.mubr.msk.f32.vlgmr.msra.gmra.mrb[16].mxu0 %vm407_vm1, %v278_v62  ;;  %v399_v20 = vadd.f32 %v965_v1, %v398_v19  ;;  %1239 = vmatprep.subr.bf16.mxu1 %v1441_v16 }
  0xfe   :  { %1151 = vmatprep.mubr.msk.f32.mxu0 %vm407_vm1, %v283_v63 }
  0xff   :  { %v1444_v21 = vpack.c.bf16 %v404_v18, %v399_v20 }
 0x101   :  { %1152 = vmatmul.mubr.msk.f32.gmra.mrb[18].mxu0 %vm407_vm1, %v288_v0 }
 0x1c8   :  { %v1136_v27 = vpop.f32.mrb[8].mxu1 }
 0x1c9   :  { %v498_v28 = vpop.f32.mrb[9].mxu1  ;;  %v646_v32 = vsel %vm634_vm4, %v1136_v27, -inf }
 0x1ca   :  { %v645_v30 = vsel %vm633_vm3, %v498_v28, -inf  ;;  %v656_v36 = vsel %vm45_vm0, %v646_v32, -inf }
 0x1cb   :  { %v653_v31 = vsel %vm45_vm0, %v645_v30, -inf }
 0x1cc   :  { %654 = vmax.xlane.f32.xlu0 %v653_v31  ;;  %v1139_v33 = vpop.f32.mrb[10].mxu1 }
 0x1cd   :  { %v508_v34 = vpop.f32.mrb[11].mxu1  ;;  %v648_v38 = vsel %vm636_vm6, %v1139_v33, -inf }
 0x1ce   :  { %v647_v35 = vsel %vm635_vm5, %v508_v34, -inf  ;;  %v662_v43 = vsel %vm45_vm0, %v648_v38, -inf }
 0x1cf   :  { %v659_v37 = vsel %vm45_vm0, %v647_v35, -inf }
 0x1d0   :  { %v1150_v39 = vpop.f32.mrb[16].mxu0  ;;  %657 = vmax.xlane.f32.xlu0 %v656_v36  ;;  %660 = vmax.xlane.f32.xlu1 %v659_v37 }
 0x1d1   :  { %v607_v40 = vpop.f32.mrb[17].mxu0  ;;  %v650_v44 = vsel %vm634_vm4, %v1150_v39, -inf }
 0x1d2   :  { %v649_v41 = vsel %vm633_vm3, %v607_v40, -inf  ;;  %v668_v49 = vsel %vm45_vm0, %v650_v44, -inf }
 0x1d3   :  { %v665_v42 = vsel %vm45_vm0, %v649_v41, -inf }
 0x1d4   :  { %v1153_v45 = vpop.f32.mrb[18].mxu0  ;;  %666 = vmax.xlane.f32.xlu0 %v665_v42  ;;  %663 = vmax.xlane.f32.xlu1 %v662_v43 }
 0x1d5   :  { %v617_v46 = vpop.f32.mrb[19].mxu0  ;;  %v652_v50 = vsel %vm636_vm6, %v1153_v45, -inf }
 0x1d6   :  { %v651_v47 = vsel %vm635_vm5, %v617_v46, -inf  ;;  %v674_v51 = vsel %vm45_vm0, %v652_v50, -inf }
 0x1d7   :  { %v671_v48 = vsel %vm45_vm0, %v651_v47, -inf }
 0x1d8   :  { %672 = vmax.xlane.f32.xlu0 %v671_v48  ;;  %669 = vmax.xlane.f32.xlu1 %v668_v49 }
 0x1dc   :  { %675 = vmax.xlane.f32.xlu1 %v674_v51 }
 0x259   :  { %v655_v52 = vpop.xlane.xlu0 %654 }
 0x25a   :  { %v677_v53 = vsub.f32 %v645_v30, %v655_v52 }
 0x25c   :  { %v685_v54 = vmul.f32 1.442695, %v677_v53 }
 0x25d   :  { %v658_v55 = vpop.xlane.xlu0 %657  ;;  %v661_v56 = vpop.xlane.xlu1 %660 }
 0x25e   :  { %1246 = vpow2.f32 %v685_v54  ;;  %v678_v57 = vsub.f32 %v646_v32, %v658_v55  ;;  %v679_v58 = vsub.f32 %v647_v35, %v661_v56 }
 0x260   :  { %v687_v59 = vmul.f32 1.442695, %v678_v57  ;;  %v689_v60 = vmul.f32 1.442695, %v679_v58 }
 0x261   :  { %v667_v61 = vpop.xlane.xlu0 %666  ;;  %v664_v62 = vpop.xlane.xlu1 %663 }
 0x262   :  { %1248 = vpow2.f32 %v687_v59  ;;  %v681_v63 = vsub.f32 %v649_v41, %v667_v61  ;;  %v680_v0 = vsub.f32 %v648_v38, %v664_v62 }
 0x263   :  { %1250 = vpow2.f32 %v689_v60 }
 0x264   :  { %v693_v1 = vmul.f32 1.442695, %v681_v63  ;;  %v691_v2 = vmul.f32 1.442695, %v680_v0 }
 0x265   :  { %v673_v3 = vpop.xlane.xlu0 %672  ;;  %v670_v4 = vpop.xlane.xlu1 %669 }
 0x266   :  { %1252 = vpow2.f32 %v693_v1  ;;  %v683_v5 = vsub.f32 %v651_v47, %v673_v3  ;;  %v682_v6 = vsub.f32 %v650_v44, %v670_v4 }
 0x267   :  { %1254 = vpow2.f32 %v691_v2 }
 0x268   :  { %v1247_v7 = vpop.eup %1246  ;;  %v697_v8 = vmul.f32 1.442695, %v683_v5  ;;  %v695_v9 = vmul.f32 1.442695, %v682_v6 }
 0x269   :  { %v676_v10 = vpop.xlane.xlu1 %675  ;;  %v701_v11 = vsel %vm45_vm0, %v1247_v7, 0.0 }
 0x26a   :  { %1256 = vpow2.f32 %v697_v8  ;;  %v684_v12 = vsub.f32 %v652_v50, %v676_v10  ;;  %702 = vadd.xlane.f32.xlu0 %v701_v11 }
 0x26b   :  { %1258 = vpow2.f32 %v695_v9 }
 0x26c   :  { %v1249_v13 = vpop.eup %1248  ;;  %v699_v14 = vmul.f32 1.442695, %v684_v12 }
 0x26d   :  { %v1251_v15 = vpop.eup %1250  ;;  %v704_v17 = vsel %vm45_vm0, %v1249_v13, 0.0 }
 0x26e   :  { %1260 = vpow2.f32 %v699_v14  ;;  %705 = vadd.xlane.f32.xlu1 %v704_v17  ;;  %v707_v18 = vsel %vm45_vm0, %v1251_v15, 0.0 }
 0x26f   :  { %708 = vadd.xlane.f32.xlu0 %v707_v18 }
 0x270   :  { %v1253_v19 = vpop.eup %1252 }
 0x271   :  { %v1255_v20 = vpop.eup %1254  ;;  %v713_v22 = vsel %vm45_vm0, %v1253_v19, 0.0 }
 0x272   :  { %v710_v23 = vsel %vm45_vm0, %v1255_v20, 0.0 }
 0x273   :  { %714 = vadd.xlane.f32.xlu0 %v713_v22  ;;  %711 = vadd.xlane.f32.xlu1 %v710_v23 }
 0x274   :  { %v1257_v24 = vpop.eup %1256 }
 0x275   :  { %v1259_v25 = vpop.eup %1258  ;;  %v719_v26 = vsel %vm45_vm0, %v1257_v24, 0.0 }
 0x276   :  { %v716_v27 = vsel %vm45_vm0, %v1259_v25, 0.0 }
 0x277   :  { %720 = vadd.xlane.f32.xlu0 %v719_v26  ;;  %717 = vadd.xlane.f32.xlu1 %v716_v27 }
 0x278   :  { %v1261_v28 = vpop.eup %1260 }
 0x279   :  { %v722_v29 = vsel %vm45_vm0, %v1261_v28, 0.0 }
 0x27b   :  { %723 = vadd.xlane.f32.xlu1 %v722_v29 }
 0x2f7   :  { %v703_v30 = vpop.xlane.xlu0 %702 }
 0x2f8   :  { %1262 = vrcp.f32 %v703_v30 }
 0x2fb   :  { %v706_v31 = vpop.xlane.xlu1 %705 }
 0x2fc   :  { %v709_v32 = vpop.xlane.xlu0 %708  ;;  %1264 = vrcp.f32 %v706_v31 }
 0x2fd   :  { %1266 = vrcp.f32 %v709_v32 }
 0x300   :  { %v715_v33 = vpop.xlane.xlu0 %714  ;;  %v712_v34 = vpop.xlane.xlu1 %711 }
 0x301   :  { %1268 = vrcp.f32 %v715_v33 }
 0x302   :  { %v1263_v35 = vpop.eup %1262  ;;  %1270 = vrcp.f32 %v712_v34 }
 0x303   :  { %v733_v36 = vmul.f32 %v1263_v35, %v1247_v7 }
 0x304   :  { %v721_v37 = vpop.xlane.xlu0 %720  ;;  %v718_v38 = vpop.xlane.xlu1 %717 }
 0x305   :  { %1272 = vrcp.f32 %v721_v37  ;;  %1162 = vmatprep.mubr.msk.f32.mxu1 %vm45_vm0, %v733_v36 }
 0x306   :  { %v1265_v39 = vpop.eup %1264  ;;  %1274 = vrcp.f32 %v718_v38 }
 0x307   :  { %v1267_v40 = vpop.eup %1266  ;;  %v734_v41 = vmul.f32 %v1265_v39, %v1249_v13 }
 0x308   :  { %v724_v42 = vpop.xlane.xlu1 %723  ;;  %v735_v43 = vmul.f32 %v1267_v40, %v1251_v15 }
 0x309   :  { %1276 = vrcp.f32 %v724_v42  ;;  %1163 = vmatmul.mubr.msk.f32.vlgmr.msra.gmra.mrb[12].mxu1 %vm45_vm0, %v734_v41 }
 0x30a   :  { %1241 = vmatpush3.bf16.msra.mxu1 %v1441_v16  ;;  %1165 = vmatprep.mubr.msk.f32.mxu1 %vm45_vm0, %v735_v43 }
 0x30b   :  { %v1269_v44 = vpop.eup %1268  ;;  %1243 = vmatprep.subr.bf16.mxu1 %v1444_v21 }
 0x30c   :  { %v1271_v45 = vpop.eup %1270  ;;  %v737_v46 = vmul.f32 %v1269_v44, %v1253_v19 }
 0x30d   :  { %v736_v47 = vmul.f32 %v1271_v45, %v1255_v20 }
 0x30e   :  { %1245 = vmatpush3.bf16.msra.mxu1 %v1444_v21 }
 0x30f   :  { %v1273_v48 = vpop.eup %1272  ;;  %1166 = vmatmul.mubr.msk.f32.gmra.mrb[14].mxu1 %vm45_vm0, %v736_v47 }
 0x310   :  { %v1275_v49 = vpop.eup %1274  ;;  %1176 = vmatprep.mubr.msk.f32.mxu1 %vm45_vm0, %v737_v46  ;;  %v739_v50 = vmul.f32 %v1273_v48, %v1257_v24 }
 0x311   :  { %v738_v51 = vmul.f32 %v1275_v49, %v1259_v25 }
 0x313   :  { %v1277_v52 = vpop.eup %1276  ;;  %1177 = vmatmul.mubr.msk.f32.vlgmr.msra.gmra.mrb[16].mxu1 %vm45_vm0, %v738_v51 }
 0x314   :  { %1179 = vmatprep.mubr.msk.f32.mxu1 %vm45_vm0, %v739_v50  ;;  %v740_v16 = vmul.f32 %v1277_v52, %v1261_v28 }
 0x317   :  { %1180 = vmatmul.mubr.msk.f32.gmra.mrb[18].mxu1 %vm45_vm0, %v740_v16 }
 0x3dc   :  { %v1164_v53 = vpop.f32.mrb[12].mxu1 }
 0x3dd   :  { %936 = vst.msk [vmem:[%s1520_s7 + $0x8] sm:$0xff] %vm407_vm1, %v1164_v53  ;;  %v819_v21 = vpop.f32.mrb[13].mxu1 }
 0x3de   :  { %935 = vst.msk [vmem:[%s1520_s7] sm:$0xff] %vm407_vm1, %v819_v21 }
 0x3e2   :  { %v1167_v54 = vpop.f32.mrb[14].mxu1 }
 0x3e3   :  { %938 = vst.msk [vmem:[%s1520_s7 + $0x18] sm:$0xff] %vm407_vm1, %v1167_v54  ;;  %v829_v55 = vpop.f32.mrb[15].mxu1 }
 0x3e4   :  { %937 = vst.msk [vmem:[%s1520_s7 + $0x10] sm:$0xff] %vm407_vm1, %v829_v55 }
 0x3e6   :  { %v1178_v56 = vpop.f32.mrb[16].mxu1 }
 0x3e7   :  { %940 = vst.msk [vmem:[%s1520_s7 + $0x28] sm:$0xff] %vm407_vm1, %v1178_v56  ;;  %v916_v57 = vpop.f32.mrb[17].mxu1 }
 0x3e8   :  { %939 = vst.msk [vmem:[%s1520_s7 + $0x20] sm:$0xff] %vm407_vm1, %v916_v57 }
 0x3ea   :  { %v1181_v58 = vpop.f32.mrb[18].mxu1 }
 0x3eb   :  { %942 = vst.msk [vmem:[%s1520_s7 + $0x38] sm:$0xff] %vm407_vm1, %v1181_v58  ;;  %v926_v59 = vpop.f32.mrb[19].mxu1 }
 0x3ec   :  { %941 = vst.msk [vmem:[%s1520_s7 + $0x30] sm:$0xff] %vm407_vm1, %v926_v59 }

</bundles_post_ra>
